<compile_context>
chip_gen: v5e
topology: v5e:2x2
jax: 0.10.0
libtpu: 0.0.40
codegen_flags: <defaults>
</compile_context>

<pallas_src>
import functools

import jax
import jax.numpy as jnp
from jax import lax
from jax.experimental import pallas as pl
from jax.experimental.pallas import tpu as pltpu


def _round_up(n, m):
    return ((n + m - 1) // m) * m


def feature_encoder_kernel(x_ref, w_ref, b_ref, g_ref, o_ref, *, inv_dim, eps):
    # x_ref: (tm, Kp), w_ref: (Kp, Dp), b_ref/g_ref: (1, Dp), o_ref: (tm, Dp)
    x = x_ref[...]
    # Linear: y = x @ W + b  (MXU matmul, f32 accumulate; bias kept in f32)
    y = jnp.dot(x, w_ref[...], preferred_element_type=jnp.float32) + b_ref[...]

    # RMSNorm in float32 (matches `x.float()` in the PyTorch module).
    # Padded columns of y are exactly zero (zero-padded W rows/cols and bias),
    # so sum over the padded width times 1/true_emb_dim is the true mean.
    mean_sq = jnp.sum(y * y, axis=-1, keepdims=True) * inv_dim
    normed = y * lax.rsqrt(mean_sq + eps)

    # Apply gamma in f32, single cast to the activation/output dtype.
    # (For bf16 activations this differs from PyTorch only by one rounding of
    #  the normalized value before the gain multiply — negligible.)
    o_ref[...] = (normed * g_ref[...]).astype(o_ref.dtype)


def _build_call(Np, Kp, Dp, tm, out_dtype, x_dtype, w_dtype,
                inv_dim, eps, vmem_limit, single_buffer_consts):
    const_kwargs = {}
    if single_buffer_consts:
        # Constant-index blocks are only DMA'd once; single-buffer them to
        # halve their VMEM footprint (frees VMEM for a bigger row tile).
        const_kwargs = dict(pipeline_mode=pl.Buffered(1))

    kernel = functools.partial(feature_encoder_kernel, inv_dim=inv_dim, eps=eps)

    return pl.pallas_call(
        kernel,
        out_shape=jax.ShapeDtypeStruct((Np, Dp), out_dtype),
        grid_spec=pltpu.PrefetchScalarGridSpec(
            num_scalar_prefetch=0,
            grid=(Np // tm,),
            in_specs=[
                pl.BlockSpec((tm, Kp), lambda i: (i, 0)),              # x row tile
                pl.BlockSpec((Kp, Dp), lambda i: (0, 0), **const_kwargs),  # full W
                pl.BlockSpec((1, Dp), lambda i: (0, 0), **const_kwargs),   # bias
                pl.BlockSpec((1, Dp), lambda i: (0, 0), **const_kwargs),   # gamma
            ],
            out_specs=pl.BlockSpec((tm, Dp), lambda i: (i, 0)),
        ),
        compiler_params=pltpu.CompilerParams(
            dimension_semantics=("parallel",),   # row axis shards across cores
            vmem_limit_bytes=vmem_limit,
        ),
    )


def feature_encoder(x, w, b, gamma, *, eps=1e-6, tm=512, compute_dtype=None):
    """x: [N, input_dim], w: [input_dim, emb_dim], b/gamma: [emb_dim]."""
    N, K = x.shape
    D = w.shape[1]

    out_dtype = x.dtype
    mm_dtype = compute_dtype if compute_dtype is not None else x.dtype

    # Lane-dense padding of the contraction and feature dims.
    Kp = _round_up(K, 128)
    Dp = _round_up(D, 128)

    # Row tile: large to amortize per-step overhead, but never bigger than the
    # (8-rounded) batch; pad N to a tile multiple instead of asserting.
    tm_eff = _round_up(min(tm, _round_up(N, 8)), 8)
    Np = _round_up(N, tm_eff)

    xp = jnp.pad(x, ((0, Np - N), (0, Kp - K))).astype(mm_dtype)
    wp = jnp.pad(w, ((0, Kp - K), (0, Dp - D))).astype(mm_dtype)
    bp = jnp.pad(b, (0, Dp - D)).reshape(1, Dp).astype(jnp.float32)
    gp = jnp.pad(gamma, (0, Dp - D)).reshape(1, Dp).astype(jnp.float32)

    inv_dim = 1.0 / float(D)   # mean over the *true* emb_dim

    # VMEM budget: double-buffered x/out tiles + (up to double-buffered) W +
    # bias/gamma, with 2x headroom, clamped to [32 MiB default, 64 MiB v7x cap].
    mm_bytes = jnp.dtype(mm_dtype).itemsize
    out_bytes = jnp.dtype(out_dtype).itemsize
    needed = (2 * tm_eff * Kp * mm_bytes
              + 2 * tm_eff * Dp * out_bytes
              + 2 * Kp * Dp * mm_bytes
              + 4 * Dp * 4)
    vmem_limit = int(min(64 << 20, max(2 * needed, 32 << 20)))

    try:
        call = _build_call(Np, Kp, Dp, tm_eff, out_dtype, mm_dtype, mm_dtype,
                           inv_dim, eps, vmem_limit, single_buffer_consts=True)
        out = call(xp, wp, bp, gp)
    except Exception:
        # Older/newer JAX without BlockSpec pipeline_mode support: use defaults.
        call = _build_call(Np, Kp, Dp, tm_eff, out_dtype, mm_dtype, mm_dtype,
                           inv_dim, eps, vmem_limit, single_buffer_consts=False)
        out = call(xp, wp, bp, gp)

    return out[:N, :D]


def feature_encoder_ref(x, w, b, gamma, eps=1e-6):
    y = x @ w + b
    yf = y.astype(jnp.float32)
    normed = yf * lax.rsqrt(jnp.mean(yf * yf, axis=-1, keepdims=True) + eps)
    return normed.astype(x.dtype) * gamma


if __name__ == "__main__":
    N, input_dim, emb_dim = 8, 16, 32

    key = jax.random.PRNGKey(0)
    kx, kw, kb, kg = jax.random.split(key, 4)

    x = jax.random.normal(kx, (N, input_dim), dtype=jnp.float32)
    # Synthetic parameters (shapes match nn.Linear + RMSNorm).
    w = jax.random.normal(kw, (input_dim, emb_dim), dtype=jnp.float32) * (1.0 / (input_dim ** 0.5))
    b = jax.random.normal(kb, (emb_dim,), dtype=jnp.float32) * 0.01
    gamma = jnp.ones((emb_dim,), dtype=jnp.float32)  # RMSNorm weight init = ones

    out = feature_encoder(x, w, b, gamma)
    out = jax.block_until_ready(out)

    ref = feature_encoder_ref(x, w, b, gamma)
    assert out.shape == (N, emb_dim)
    assert jnp.allclose(out, ref, atol=1e-5, rtol=1e-5), "mismatch vs reference"

    print("KERNEL_OK")
</pallas_src>

<mosaic_0001>
module attributes {stable_mosaic.version = 11 : i64} {
  func.func @feature_encoder_kernel(%arg0: i32, %arg1: memref<8x128xf32, #tpu.memory_space<vmem>>, %arg2: memref<128x128xf32, #tpu.memory_space<vmem>>, %arg3: memref<1x128xf32, #tpu.memory_space<vmem>>, %arg4: memref<1x128xf32, #tpu.memory_space<vmem>>, %arg5: memref<8x128xf32, #tpu.memory_space<vmem>>) attributes {dimension_semantics = [#tpu.dimension_semantics<parallel>], iteration_bounds = array<i64: 1>, scalar_prefetch = 0 : i64, scratch_operands = 0 : i64, tpu.core_type = #tpu.core_type<tc>, window_params = [{transform_indices = @transform_0, window_bounds = array<i64: 8, 128>}, {pipeline_mode = #tpu.pipeline_mode<synchronous>, transform_indices = @transform_1, window_bounds = array<i64: 128, 128>}, {pipeline_mode = #tpu.pipeline_mode<synchronous>, transform_indices = @transform_2, window_bounds = array<i64: 1, 128>}, {pipeline_mode = #tpu.pipeline_mode<synchronous>, transform_indices = @transform_3, window_bounds = array<i64: 1, 128>}, {transform_indices = @transform_4, window_bounds = array<i64: 8, 128>}]} {
    %c0 = arith.constant 0 : index
    %c0_0 = arith.constant 0 : index
    %0 = vector.load %arg1[%c0, %c0_0] : memref<8x128xf32, #tpu.memory_space<vmem>>, vector<8x128xf32>
    %c0_1 = arith.constant 0 : index
    %c0_2 = arith.constant 0 : index
    %1 = vector.load %arg2[%c0_1, %c0_2] : memref<128x128xf32, #tpu.memory_space<vmem>>, vector<128x128xf32>
    %cst = arith.constant dense<0.000000e+00> : vector<8x128xf32>
    %2 = tpu.matmul %0, %1, %cst {dimension_numbers = #tpu.dot_dimension_numbers<[1], [0], [0], [1], [0, 0, 1, 1], [], []>} : vector<8x128xf32>, vector<128x128xf32>, vector<8x128xf32> -> vector<8x128xf32>
    %c0_3 = arith.constant 0 : index
    %c0_4 = arith.constant 0 : index
    %3 = vector.load %arg3[%c0_3, %c0_4] : memref<1x128xf32, #tpu.memory_space<vmem>>, vector<1x128xf32>
    %4 = vector.broadcast %3 : vector<1x128xf32> to vector<8x128xf32>
    %5 = arith.addf %2, %4 : vector<8x128xf32>
    %6 = arith.mulf %5, %5 : vector<8x128xf32>
    %cst_5 = arith.constant dense<0.000000e+00> : vector<8xf32>
    %7 = vector.multi_reduction <add>, %6, %cst_5 [1] : vector<8x128xf32> to vector<8xf32>
    %8 = vector.shape_cast %7 : vector<8xf32> to vector<8x1xf32>
    %cst_6 = arith.constant 3.125000e-02 : f32
    %9 = vector.broadcast %cst_6 : f32 to vector<8x1xf32>
    %10 = arith.mulf %8, %9 : vector<8x1xf32>
    %cst_7 = arith.constant 9.99999997E-7 : f32
    %11 = vector.broadcast %cst_7 : f32 to vector<8x1xf32>
    %12 = arith.addf %10, %11 : vector<8x1xf32>
    %13 = math.rsqrt %12 : vector<8x1xf32>
    %14 = vector.broadcast %13 : vector<8x1xf32> to vector<8x128xf32>
    %15 = arith.mulf %5, %14 : vector<8x128xf32>
    %c0_8 = arith.constant 0 : index
    %c0_9 = arith.constant 0 : index
    %16 = vector.load %arg4[%c0_8, %c0_9] : memref<1x128xf32, #tpu.memory_space<vmem>>, vector<1x128xf32>
    %17 = vector.broadcast %16 : vector<1x128xf32> to vector<8x128xf32>
    %18 = arith.mulf %15, %17 : vector<8x128xf32>
    %c0_10 = arith.constant 0 : index
    %c0_11 = arith.constant 0 : index
    %19 = vector.load %arg5[%c0_10, %c0_11] : memref<8x128xf32, #tpu.memory_space<vmem>>, vector<8x128xf32>
    tpu.vector_store %arg5[%c0_10, %c0_11], %18 {strides = array<i32>} : memref<8x128xf32, #tpu.memory_space<vmem>>, vector<8x128xf32>,
    return
  }
  func.func @transform_0(%arg0: i32) -> (i32, i32) {
    %c0_i32 = arith.constant 0 : i32
    %c0_i32_0 = arith.constant 0 : i32
    return %arg0, %c0_i32 : i32, i32
  }
  func.func @transform_1(%arg0: i32) -> (i32, i32) {
    %c0_i32 = arith.constant 0 : i32
    %c0_i32_0 = arith.constant 0 : i32
    %c0_i32_1 = arith.constant 0 : i32
    return %c0_i32, %c0_i32_0 : i32, i32
  }
  func.func @transform_2(%arg0: i32) -> (i32, i32) {
    %c0_i32 = arith.constant 0 : i32
    %c0_i32_0 = arith.constant 0 : i32
    %c0_i32_1 = arith.constant 0 : i32
    return %c0_i32, %c0_i32_0 : i32, i32
  }
  func.func @transform_3(%arg0: i32) -> (i32, i32) {
    %c0_i32 = arith.constant 0 : i32
    %c0_i32_0 = arith.constant 0 : i32
    %c0_i32_1 = arith.constant 0 : i32
    return %c0_i32, %c0_i32_0 : i32, i32
  }
  func.func @transform_4(%arg0: i32) -> (i32, i32) {
    %c0_i32 = arith.constant 0 : i32
    %c0_i32_0 = arith.constant 0 : i32
    return %arg0, %c0_i32 : i32, i32
  }
}

module attributes {stable_mosaic.version = 11 : i64} {
  func.func @feature_encoder_kernel(%arg0: i32, %arg1: memref<8x128xf32, #tpu.memory_space<vmem>>, %arg2: memref<128x128xf32, #tpu.memory_space<vmem>>, %arg3: memref<1x128xf32, #tpu.memory_space<vmem>>, %arg4: memref<1x128xf32, #tpu.memory_space<vmem>>, %arg5: memref<8x128xf32, #tpu.memory_space<vmem>>) attributes {dimension_semantics = [#tpu.dimension_semantics<parallel>], iteration_bounds = array<i64: 1>, scalar_prefetch = 0 : i64, scratch_operands = 0 : i64, tpu.core_type = #tpu.core_type<tc>, window_params = [{transform_indices = @transform_0, window_bounds = array<i64: 8, 128>}, {pipeline_mode = #tpu.pipeline_mode<synchronous>, transform_indices = @transform_1, window_bounds = array<i64: 128, 128>}, {pipeline_mode = #tpu.pipeline_mode<synchronous>, transform_indices = @transform_2, window_bounds = array<i64: 1, 128>}, {pipeline_mode = #tpu.pipeline_mode<synchronous>, transform_indices = @transform_3, window_bounds = array<i64: 1, 128>}, {transform_indices = @transform_4, window_bounds = array<i64: 8, 128>}]} {
    %c0 = arith.constant 0 : index
    %c0_0 = arith.constant 0 : index
    %0 = vector.load %arg1[%c0, %c0_0] : memref<8x128xf32, #tpu.memory_space<vmem>>, vector<8x128xf32>
    %c0_1 = arith.constant 0 : index
    %c0_2 = arith.constant 0 : index
    %1 = vector.load %arg2[%c0_1, %c0_2] : memref<128x128xf32, #tpu.memory_space<vmem>>, vector<128x128xf32>
    %cst = arith.constant dense<0.000000e+00> : vector<8x128xf32>
    %2 = tpu.matmul %0, %1, %cst {dimension_numbers = #tpu.dot_dimension_numbers<[1], [0], [0], [1], [0, 0, 1, 1], [], []>} : vector<8x128xf32>, vector<128x128xf32>, vector<8x128xf32> -> vector<8x128xf32>
    %c0_3 = arith.constant 0 : index
    %c0_4 = arith.constant 0 : index
    %3 = vector.load %arg3[%c0_3, %c0_4] : memref<1x128xf32, #tpu.memory_space<vmem>>, vector<1x128xf32>
    %4 = vector.broadcast %3 : vector<1x128xf32> to vector<8x128xf32>
    %5 = arith.addf %2, %4 : vector<8x128xf32>
    %6 = arith.mulf %5, %5 : vector<8x128xf32>
    %cst_5 = arith.constant dense<0.000000e+00> : vector<8xf32>
    %7 = vector.multi_reduction <add>, %6, %cst_5 [1] : vector<8x128xf32> to vector<8xf32>
    %8 = vector.shape_cast %7 : vector<8xf32> to vector<8x1xf32>
    %cst_6 = arith.constant 3.125000e-02 : f32
    %9 = vector.broadcast %cst_6 : f32 to vector<8x1xf32>
    %10 = arith.mulf %8, %9 : vector<8x1xf32>
    %cst_7 = arith.constant 9.99999997E-7 : f32
    %11 = vector.broadcast %cst_7 : f32 to vector<8x1xf32>
    %12 = arith.addf %10, %11 : vector<8x1xf32>
    %13 = math.rsqrt %12 : vector<8x1xf32>
    %14 = vector.broadcast %13 : vector<8x1xf32> to vector<8x128xf32>
    %15 = arith.mulf %5, %14 : vector<8x128xf32>
    %c0_8 = arith.constant 0 : index
    %c0_9 = arith.constant 0 : index
    %16 = vector.load %arg4[%c0_8, %c0_9] : memref<1x128xf32, #tpu.memory_space<vmem>>, vector<1x128xf32>
    %17 = vector.broadcast %16 : vector<1x128xf32> to vector<8x128xf32>
    %18 = arith.mulf %15, %17 : vector<8x128xf32>
    %c0_10 = arith.constant 0 : index
    %c0_11 = arith.constant 0 : index
    %19 = vector.load %arg5[%c0_10, %c0_11] : memref<8x128xf32, #tpu.memory_space<vmem>>, vector<8x128xf32>
    tpu.vector_store %arg5[%c0_10, %c0_11], %18 {strides = array<i32>} : memref<8x128xf32, #tpu.memory_space<vmem>>, vector<8x128xf32>,
    return
  }
  func.func @transform_0(%arg0: i32) -> (i32, i32) {
    %c0_i32 = arith.constant 0 : i32
    %c0_i32_0 = arith.constant 0 : i32
    return %arg0, %c0_i32 : i32, i32
  }
  func.func @transform_1(%arg0: i32) -> (i32, i32) {
    %c0_i32 = arith.constant 0 : i32
    %c0_i32_0 = arith.constant 0 : i32
    %c0_i32_1 = arith.constant 0 : i32
    return %c0_i32, %c0_i32_0 : i32, i32
  }
  func.func @transform_2(%arg0: i32) -> (i32, i32) {
    %c0_i32 = arith.constant 0 : i32
    %c0_i32_0 = arith.constant 0 : i32
    %c0_i32_1 = arith.constant 0 : i32
    return %c0_i32, %c0_i32_0 : i32, i32
  }
  func.func @transform_3(%arg0: i32) -> (i32, i32) {
    %c0_i32 = arith.constant 0 : i32
    %c0_i32_0 = arith.constant 0 : i32
    %c0_i32_1 = arith.constant 0 : i32
    return %c0_i32, %c0_i32_0 : i32, i32
  }
  func.func @transform_4(%arg0: i32) -> (i32, i32) {
    %c0_i32 = arith.constant 0 : i32
    %c0_i32_0 = arith.constant 0 : i32
    return %arg0, %c0_i32 : i32, i32
  }
}

</mosaic_0001>

<bundles_post_ra>
// kernel: tpu_custom_call.1
= control target key start
LH: loop header
LB: loop body
LE: loop exit
PB: predicated region body
PF: predicated region fallthrough
CT: control target
= control target key end

     0   :  { %9 = vsyncpa [#allocation3], 0  ;;  %s261_s0 = inlined_call_operand.hbm [shape: f32[8,128], index: 0, kind: input, shape index: {}]   ;;  %s262_s1 = inlined_call_operand.hbm [shape: f32[128,128], index: 1, kind: input, shape index: {}]   ;;  %s263_s2 = inlined_call_operand.vmem [shape: f32[1,128], index: 2, kind: input, shape index: {}]   ;;  %s264_s3 = inlined_call_operand.vmem [shape: f32[1,128], index: 3, kind: input, shape index: {}]   ;;  %s265_s4 = inlined_call_operand.hbm [shape: f32[8,128], index: 4, kind: output, shape index: {}]  }
   0x1   :  { %10 = vsyncpa [#allocation6], 0 }
   0x2   :  { %11 = vsyncpa [#allocation4], 0  ;;  %s17_s17 = sshll.u32 %s261_s0, 4  ;;  %s216_s18 = smov [#allocation2]   ;;  %s18_s17 = int_to_ptr.hbm [resolvable:$true] %s17_s17 }
   0x3   :  { %s19_s19 = sshll.u32 %s216_s18, 4  ;;  %s27_s22 = sshll.u32 %s262_s1, 4  ;;  %s20_s19 = int_to_ptr.vmem [resolvable:$true] %s19_s19  ;;  %s28_s22 = int_to_ptr.hbm [resolvable:$true] %s27_s22 }
   0x4   :  { %22 = dma.hbm_to_vmem [thread:$0]  %s18_s17, 128, %s20_s19, [#allocation3]  }
   0x5   :  { %s217_s23 = smov [#allocation5]   ;;  %s218_s25 = smov 128  }
   0x6   :  { %s29_s24 = sshll.u32 %s217_s23, 4  ;;  %s219_s26 = smov 8   ;;  %s30_s24 = int_to_ptr.vmem [resolvable:$true] %s29_s24 }
   0x7   :  { %35 = dma.hbm_to_vmem [thread:$0]  %s28_s22, 2048, %s30_s24, [#allocation6], %s218_s25, %s218_s25, %s219_s26  }
   0x8   :  { %210 = dma.done.wait [#allocation3], 128  }
   0x9   :  { %211 = vsyncadd [#allocation3], 4294967168 }
   0xa   :  { %212 = dma.done.wait [#allocation6], 2048  }
   0xb   :  { %213 = vsyncadd [#allocation6], 4294965248  ;;  %v64_v0 = vld [vmem:[#allocation5 + $0x78] sm:$0xff]  ;;  %v63_v1 = vld [vmem:[#allocation5 + $0x70] sm:$0xff]  ;;  %s118_s6 = sshll.u32 %s265_s4, 4  ;;  %s119_s6 = int_to_ptr.hbm [resolvable:$true] %s118_s6 }
   0xc   :  { %69 = vmatpush.msra.mxu0 %v64_v0  ;;  %v62_v2 = vld [vmem:[#allocation5 + $0x68] sm:$0xff]  ;;  %v61_v3 = vld [vmem:[#allocation5 + $0x60] sm:$0xff]  ;;  %v60_v4 = vld [vmem:[#allocation5 + $0x58] sm:$0xff] }
   0xd   :  { %v59_v5 = vld [vmem:[#allocation5 + $0x50] sm:$0xff]  ;;  %v58_v6 = vld [vmem:[#allocation5 + $0x48] sm:$0xff]  ;;  %v57_v7 = vld [vmem:[#allocation5 + $0x40] sm:$0xff] }
   0xe   :  { %70 = vmatpush.msra.mxu0 %v63_v1  ;;  %v56_v8 = vld [vmem:[#allocation5 + $0x38] sm:$0xff]  ;;  %v55_v9 = vld [vmem:[#allocation5 + $0x30] sm:$0xff]  ;;  %v54_v10 = vld [vmem:[#allocation5 + $0x28] sm:$0xff] }
   0xf   :  { %v53_v11 = vld [vmem:[#allocation5 + $0x20] sm:$0xff]  ;;  %v52_v12 = vld [vmem:[#allocation5 + $0x18] sm:$0xff]  ;;  %v51_v13 = vld [vmem:[#allocation5 + $0x10] sm:$0xff] }
  0x10   :  { %71 = vmatpush.msra.mxu0 %v62_v2  ;;  %v50_v14 = vld [vmem:[#allocation5 + $0x8] sm:$0xff]  ;;  %v49_v15 = vld [vmem:[#allocation5] sm:$0xff]  ;;  %v48_v16 = vld [vmem:[#allocation2] sm:$0xff] }
  0x11   :  { %v134_v17 = vld [vmem:[%s263_s2] ss:$0 sm:$0xff]  ;;  %s220_s2 = smov [#allocation7]  }
  0x12   :  { %72 = vmatpush.msra.mxu0 %v61_v3  ;;  %v135_v30 = vld [vmem:[%s264_s3] ss:$0 sm:$0xff]  ;;  %s116_s29 = sshll.u32 %s220_s2, 4  ;;  %s117_s29 = int_to_ptr.vmem [resolvable:$true] %s116_s29 }
  0x14   :  { %73 = vmatpush.msra.mxu0 %v60_v4 }
  0x16   :  { %74 = vmatpush.msra.mxu0 %v59_v5 }
  0x18   :  { %75 = vmatpush.msra.mxu0 %v58_v6 }
  0x1a   :  { %76 = vmatpush.msra.mxu0 %v57_v7 }
  0x1c   :  { %77 = vmatpush.msra.mxu0 %v56_v8 }
  0x1e   :  { %78 = vmatpush.msra.mxu0 %v55_v9 }
  0x20   :  { %79 = vmatpush.msra.mxu0 %v54_v10 }
  0x22   :  { %80 = vmatpush.msra.mxu0 %v53_v11 }
  0x24   :  { %81 = vmatpush.msra.mxu0 %v52_v12 }
  0x26   :  { %82 = vmatpush.msra.mxu0 %v51_v13 }
  0x28   :  { %83 = vmatpush.msra.mxu0 %v50_v14 }
  0x2a   :  { %84 = vmatpush.msra.mxu0 %v49_v15 }
  0x2b   :  { %85 = vmatmul.f32.vlgmr.msra.gmra.mxu0 %v48_v16 }
  0xa8   :  { %v86_v18 = vpop.f32.mrf.mxu0 }
  0xa9   :  { %v87_v19 = vadd.f32 %v134_v17, %v86_v18 }
  0xab   :  { %v89_v20 = vmul.f32 %v87_v19, %v87_v19 }
  0xad   :  { %90 = vadd.xlane.f32.xlu0 %v89_v20 }
 0x120   :  { %v91_v21 = vpop.xlane.xlu0 %90 }
 0x121   :  { %v92_v22 = vmul.f32 0.03125, %v91_v21 }
 0x123   :  { %v93_v23 = vadd.f32 1e-06, %v92_v22 }
 0x125   :  { %136 = vrsqrt.f32 %v93_v23  ;;  %vm100_vm1 = vweird.f32 %v93_v23 }
 0x12b   :  { %v137_v24 = vpop.eup %136 }
 0x12c   :  { %v95_v25 = vmul.f32 %v137_v24, %v93_v23  ;;  %vm101_vm0 = vweird.f32 %v137_v24 }
 0x12d   :  { %vm102_vm2 = vmor %vm100_vm1, %vm101_vm0 }
 0x12e   :  { %v96_v26 = vmul.f32 %v137_v24, %v95_v25 }
 0x130   :  { %v97_v27 = vmul.f32 0.5, %v96_v26 }
 0x132   :  { %v98_v28 = vsub.f32 1.5, %v97_v27 }
 0x134   :  { %v99_v29 = vmul.f32 %v137_v24, %v98_v28 }
 0x136   :  { %v103_v31 = vsel %vm102_vm2, %v137_v24, %v99_v29 }
 0x137   :  { %v104_v32 = vmul.f32 %v103_v31, %v87_v19 }
 0x139   :  { %v109_v33 = vmul.f32 %v135_v30, %v104_v32 }
 0x13b   :  { %110 = vst [vmem:[#allocation7] sm:$0xff] %v109_v33 }
 0x13c   :  { %121 = dma.vmem_to_hbm [thread:$0]  %s117_s29, 128, %s119_s6, [#allocation4]  }
 0x13d   :  { %214 = dma.done.wait [#allocation4], 128  }
 0x13e   :  { %215 = vsyncadd [#allocation4], 4294967168 }
 0x13f   :  { %126 = vsyncpa [#allocation3], 1 }
 0x140   :  { %127 = vsyncpa [#allocation6], 1 }
 0x141   :  { %128 = vsyncpa [#allocation4], 1 }

// kernel: tpu_custom_call.1
= control target key start
LH: loop header
LB: loop body
LE: loop exit
PB: predicated region body
PF: predicated region fallthrough
CT: control target
= control target key end

     0   :  { %9 = vsyncpa [#allocation3], 0  ;;  %s261_s0 = inlined_call_operand.hbm [shape: f32[8,128], index: 0, kind: input, shape index: {}]   ;;  %s262_s1 = inlined_call_operand.hbm [shape: f32[128,128], index: 1, kind: input, shape index: {}]   ;;  %s263_s2 = inlined_call_operand.vmem [shape: f32[1,128], index: 2, kind: input, shape index: {}]   ;;  %s264_s3 = inlined_call_operand.vmem [shape: f32[1,128], index: 3, kind: input, shape index: {}]   ;;  %s265_s4 = inlined_call_operand.hbm [shape: f32[8,128], index: 4, kind: output, shape index: {}]  }
   0x1   :  { %10 = vsyncpa [#allocation6], 0 }
   0x2   :  { %11 = vsyncpa [#allocation4], 0  ;;  %s17_s17 = sshll.u32 %s261_s0, 4  ;;  %s216_s18 = smov [#allocation2]   ;;  %s18_s17 = int_to_ptr.hbm [resolvable:$true] %s17_s17 }
   0x3   :  { %s19_s19 = sshll.u32 %s216_s18, 4  ;;  %s27_s22 = sshll.u32 %s262_s1, 4  ;;  %s20_s19 = int_to_ptr.vmem [resolvable:$true] %s19_s19  ;;  %s28_s22 = int_to_ptr.hbm [resolvable:$true] %s27_s22 }
   0x4   :  { %22 = dma.hbm_to_vmem [thread:$0]  %s18_s17, 128, %s20_s19, [#allocation3]  }
   0x5   :  { %s217_s23 = smov [#allocation5]   ;;  %s218_s25 = smov 128  }
   0x6   :  { %s29_s24 = sshll.u32 %s217_s23, 4  ;;  %s219_s26 = smov 8   ;;  %s30_s24 = int_to_ptr.vmem [resolvable:$true] %s29_s24 }
   0x7   :  { %35 = dma.hbm_to_vmem [thread:$0]  %s28_s22, 2048, %s30_s24, [#allocation6], %s218_s25, %s218_s25, %s219_s26  }
   0x8   :  { %210 = dma.done.wait [#allocation3], 128  }
   0x9   :  { %211 = vsyncadd [#allocation3], 4294967168 }
   0xa   :  { %212 = dma.done.wait [#allocation6], 2048  }
   0xb   :  { %213 = vsyncadd [#allocation6], 4294965248  ;;  %v64_v0 = vld [vmem:[#allocation5 + $0x78] sm:$0xff]  ;;  %v63_v1 = vld [vmem:[#allocation5 + $0x70] sm:$0xff]  ;;  %s118_s6 = sshll.u32 %s265_s4, 4  ;;  %s119_s6 = int_to_ptr.hbm [resolvable:$true] %s118_s6 }
   0xc   :  { %69 = vmatpush.msra.mxu0 %v64_v0  ;;  %v62_v2 = vld [vmem:[#allocation5 + $0x68] sm:$0xff]  ;;  %v61_v3 = vld [vmem:[#allocation5 + $0x60] sm:$0xff]  ;;  %v60_v4 = vld [vmem:[#allocation5 + $0x58] sm:$0xff] }
   0xd   :  { %v59_v5 = vld [vmem:[#allocation5 + $0x50] sm:$0xff]  ;;  %v58_v6 = vld [vmem:[#allocation5 + $0x48] sm:$0xff]  ;;  %v57_v7 = vld [vmem:[#allocation5 + $0x40] sm:$0xff] }
   0xe   :  { %70 = vmatpush.msra.mxu0 %v63_v1  ;;  %v56_v8 = vld [vmem:[#allocation5 + $0x38] sm:$0xff]  ;;  %v55_v9 = vld [vmem:[#allocation5 + $0x30] sm:$0xff]  ;;  %v54_v10 = vld [vmem:[#allocation5 + $0x28] sm:$0xff] }
   0xf   :  { %v53_v11 = vld [vmem:[#allocation5 + $0x20] sm:$0xff]  ;;  %v52_v12 = vld [vmem:[#allocation5 + $0x18] sm:$0xff]  ;;  %v51_v13 = vld [vmem:[#allocation5 + $0x10] sm:$0xff] }
  0x10   :  { %71 = vmatpush.msra.mxu0 %v62_v2  ;;  %v50_v14 = vld [vmem:[#allocation5 + $0x8] sm:$0xff]  ;;  %v49_v15 = vld [vmem:[#allocation5] sm:$0xff]  ;;  %v48_v16 = vld [vmem:[#allocation2] sm:$0xff] }
  0x11   :  { %v134_v17 = vld [vmem:[%s263_s2] ss:$0 sm:$0xff]  ;;  %s220_s2 = smov [#allocation7]  }
  0x12   :  { %72 = vmatpush.msra.mxu0 %v61_v3  ;;  %v135_v30 = vld [vmem:[%s264_s3] ss:$0 sm:$0xff]  ;;  %s116_s29 = sshll.u32 %s220_s2, 4  ;;  %s117_s29 = int_to_ptr.vmem [resolvable:$true] %s116_s29 }
  0x14   :  { %73 = vmatpush.msra.mxu0 %v60_v4 }
  0x16   :  { %74 = vmatpush.msra.mxu0 %v59_v5 }
  0x18   :  { %75 = vmatpush.msra.mxu0 %v58_v6 }
  0x1a   :  { %76 = vmatpush.msra.mxu0 %v57_v7 }
  0x1c   :  { %77 = vmatpush.msra.mxu0 %v56_v8 }
  0x1e   :  { %78 = vmatpush.msra.mxu0 %v55_v9 }
  0x20   :  { %79 = vmatpush.msra.mxu0 %v54_v10 }
  0x22   :  { %80 = vmatpush.msra.mxu0 %v53_v11 }
  0x24   :  { %81 = vmatpush.msra.mxu0 %v52_v12 }
  0x26   :  { %82 = vmatpush.msra.mxu0 %v51_v13 }
  0x28   :  { %83 = vmatpush.msra.mxu0 %v50_v14 }
  0x2a   :  { %84 = vmatpush.msra.mxu0 %v49_v15 }
  0x2b   :  { %85 = vmatmul.f32.vlgmr.msra.gmra.mxu0 %v48_v16 }
  0xa8   :  { %v86_v18 = vpop.f32.mrf.mxu0 }
  0xa9   :  { %v87_v19 = vadd.f32 %v134_v17, %v86_v18 }
  0xab   :  { %v89_v20 = vmul.f32 %v87_v19, %v87_v19 }
  0xad   :  { %90 = vadd.xlane.f32.xlu0 %v89_v20 }
 0x120   :  { %v91_v21 = vpop.xlane.xlu0 %90 }
 0x121   :  { %v92_v22 = vmul.f32 0.03125, %v91_v21 }
 0x123   :  { %v93_v23 = vadd.f32 1e-06, %v92_v22 }
 0x125   :  { %136 = vrsqrt.f32 %v93_v23  ;;  %vm100_vm1 = vweird.f32 %v93_v23 }
 0x12b   :  { %v137_v24 = vpop.eup %136 }
 0x12c   :  { %v95_v25 = vmul.f32 %v137_v24, %v93_v23  ;;  %vm101_vm0 = vweird.f32 %v137_v24 }
 0x12d   :  { %vm102_vm2 = vmor %vm100_vm1, %vm101_vm0 }
 0x12e   :  { %v96_v26 = vmul.f32 %v137_v24, %v95_v25 }
 0x130   :  { %v97_v27 = vmul.f32 0.5, %v96_v26 }
 0x132   :  { %v98_v28 = vsub.f32 1.5, %v97_v27 }
 0x134   :  { %v99_v29 = vmul.f32 %v137_v24, %v98_v28 }
 0x136   :  { %v103_v31 = vsel %vm102_vm2, %v137_v24, %v99_v29 }
 0x137   :  { %v104_v32 = vmul.f32 %v103_v31, %v87_v19 }
 0x139   :  { %v109_v33 = vmul.f32 %v135_v30, %v104_v32 }
 0x13b   :  { %110 = vst [vmem:[#allocation7] sm:$0xff] %v109_v33 }
 0x13c   :  { %121 = dma.vmem_to_hbm [thread:$0]  %s117_s29, 128, %s119_s6, [#allocation4]  }
 0x13d   :  { %214 = dma.done.wait [#allocation4], 128  }
 0x13e   :  { %215 = vsyncadd [#allocation4], 4294967168 }
 0x13f   :  { %126 = vsyncpa [#allocation3], 1 }
 0x140   :  { %127 = vsyncpa [#allocation6], 1 }
 0x141   :  { %128 = vsyncpa [#allocation4], 1 }

</bundles_post_ra>
